<compile_context>
chip_gen: v7x
topology: tpu7x:2x2x1
jax: 0.10.0
libtpu: 0.0.40
codegen_flags: <defaults>
</compile_context>

<pallas_src>
import jax
import jax.numpy as jnp
from jax.experimental import pallas as pl
from jax.experimental.pallas import tpu as pltpu


# ----------------------------- config ---------------------------------------
BATCH = 2
CHANNELS = 4
SPATIAL = 16
IN_FEAT = CHANNELS * SPATIAL * SPATIAL   # 1024
Q_DOWN = 32          # q_down   (context feature size)
MEM_SIZE = 64        # memory_size
NUM_CLASSES = 10
PADDED_CLASSES = 128                     # lane-dense output width
COUNT = 2            # glimpse iterations in the original module (dead code)
NEG_BIG = -1.0e30    # padded-lane logit bias (exp() underflows to 0 in f32)
TILE_B = 512         # batch rows per grid step at large batch (fits v7x VMEM)


# --------------------------- Pallas kernel ----------------------------------
def selftaught_kernel(flat_ref, winit_ref, wq_ref, bq_ref, wmc_ref, bmc_ref,
                      out_ref):
    """Fused forward for one (TB, IN_FEAT) batch tile:
        ctx    = tanh(flat @ W_init)               (memory.init, synthetic)
        query  = relu6(ctx @ Wq + bq)              (self.qdown)
        logits = query @ W_mc + b_mc               (memory readout + classifier, pre-folded)
        out    = log_softmax(logits, axis=-1)      (lane-padded to 128)
    Images / W_init arrive in bf16; all accumulation and softmax math is f32.
    """
    # context from memory.init (synthetic projection, fused into the kernel)
    ctx = jnp.tanh(
        jnp.dot(flat_ref[...], winit_ref[...],
                preferred_element_type=jnp.float32)
    )                                                               # (TB, Q_DOWN) f32

    # query = F.relu6(self.qdown(context))
    q = jnp.dot(ctx, wq_ref[...], preferred_element_type=jnp.float32)
    q = q + bq_ref[...]                                             # (TB, MEM)
    q = jnp.clip(q, 0.0, 6.0)                                       # relu6

    # logits = classifier(memory(query))  -- the two affine layers were folded
    # into one (MEM, 128) matmul at prepare time.
    logits = jnp.dot(q, wmc_ref[...], preferred_element_type=jnp.float32)
    logits = logits + bmc_ref[...]                                  # (TB, 128)

    # F.log_softmax(..., dim=1).  Padded lanes carry bias -1e30 -> exp -> 0,
    # so they do not perturb the max or the normalizer (f32 only!).
    m = jnp.max(logits, axis=-1, keepdims=True)
    shifted = logits - m
    lse = jnp.log(jnp.sum(jnp.exp(shifted), axis=-1, keepdims=True))
    out_ref[...] = shifted - lse


def selftaught_head(flat, w_init, wq_t, bq, wmc_pad, bmc_pad, *, tb=TILE_B):
    """1-D grid over the batch axis; weights stay VMEM-resident across steps."""
    b, in_feat = flat.shape
    if b <= tb:
        # Single block covering the whole (possibly non-multiple-of-8) batch.
        tile_b, b_padded = b, b
    else:
        tile_b = tb                                   # multiple of 8 (and 128)
        b_padded = ((b + tile_b - 1) // tile_b) * tile_b
        if b_padded != b:
            flat = jnp.pad(flat, ((0, b_padded - b), (0, 0)))

    out_padded = pl.pallas_call(
        selftaught_kernel,
        out_shape=jax.ShapeDtypeStruct((b_padded, PADDED_CLASSES), jnp.float32),
        grid_spec=pltpu.PrefetchScalarGridSpec(
            num_scalar_prefetch=0,
            grid=(b_padded // tile_b,),
            in_specs=[
                # streamed per-tile
                pl.BlockSpec((tile_b, in_feat), lambda i: (i, 0)),
                # weights: full-array blocks, same index every step -> resident
                pl.BlockSpec(w_init.shape, lambda i: (0, 0)),
                pl.BlockSpec(wq_t.shape, lambda i: (0, 0)),
                pl.BlockSpec(bq.shape, lambda i: (0, 0)),
                pl.BlockSpec(wmc_pad.shape, lambda i: (0, 0)),
                pl.BlockSpec(bmc_pad.shape, lambda i: (0, 0)),
            ],
            out_specs=pl.BlockSpec((tile_b, PADDED_CLASSES), lambda i: (i, 0)),
        ),
        compiler_params=pltpu.CompilerParams(
            dimension_semantics=("parallel",),        # both TCs on v7x
            vmem_limit_bytes=32 * 1024 * 1024,        # TB=512 tiles: ~3 MiB live
        ),
    )(flat, w_init, wq_t, bq, wmc_pad, bmc_pad)
    return out_padded[:b]


# ------------------------------ forward glue ---------------------------------
def prepare_params(params):
    """One-time (outside the jitted hot path) fold + pad + dtype prep:
        W_mc = Wm @ Wc,  b_mc = bm @ Wc + bc      (no nonlinearity between them)
      then lane-pad 10 -> 128 with zero weights / -1e30 bias so log_softmax is
      unperturbed; cast the large image-projection weight to bf16 for streaming.
    """
    wmc = params["wm_t"] @ params["wc_t"]                           # (MEM, 10)
    bmc = params["bm"] @ params["wc_t"] + params["bc"]              # (1, 10)
    wmc_pad = jnp.zeros((MEM_SIZE, PADDED_CLASSES), jnp.float32)
    wmc_pad = wmc_pad.at[:, :NUM_CLASSES].set(wmc)
    bmc_pad = jnp.full((1, PADDED_CLASSES), NEG_BIG, jnp.float32)
    bmc_pad = bmc_pad.at[:, :NUM_CLASSES].set(bmc)
    return {
        "w_init": params["w_init"].astype(jnp.bfloat16),            # bf16 MXU lhs/rhs
        "wq_t": params["wq_t"],
        "bq": params["bq"],
        "wmc_pad": wmc_pad,
        "bmc_pad": bmc_pad,
    }


def selftaught_forward(image, prepared):
    B = image.shape[0]
    # Stream the flattened image in bf16 (dominant HBM traffic at scale);
    # all in-kernel accumulation / softmax math stays f32.
    flat = image.reshape(B, -1).astype(jnp.bfloat16)                # (B, IN_FEAT)

    # Glimpse loop from the original module is dead code w.r.t. the returned
    # value (its `x` is never consumed), so it is intentionally omitted.
    out_padded = selftaught_head(
        flat,
        prepared["w_init"],
        prepared["wq_t"],
        prepared["bq"],
        prepared["wmc_pad"],
        prepared["bmc_pad"],
    )
    # Consumers that can index into a lane-dense (B, 128) block may skip this
    # slice; kept here to match the module's (B, 10) return contract.
    return out_padded[:, :NUM_CLASSES]


# ------------------------------ parameters ----------------------------------
def make_params(key):
    ks = jax.random.split(key, 7)
    scale = 0.05
    # Weights generated directly in (in, out) layout so the kernel's matmul RHS
    # operands are already lane-major (out-features on the 128-lane axis).
    return {
        "w_init": scale * jax.random.normal(ks[0], (IN_FEAT, Q_DOWN), jnp.float32),
        "wq_t":   scale * jax.random.normal(ks[1], (Q_DOWN, MEM_SIZE), jnp.float32),
        "bq":     scale * jax.random.normal(ks[2], (1, MEM_SIZE), jnp.float32),
        "wm_t":   scale * jax.random.normal(ks[3], (MEM_SIZE, MEM_SIZE), jnp.float32),
        "bm":     scale * jax.random.normal(ks[4], (1, MEM_SIZE), jnp.float32),
        "wc_t":   scale * jax.random.normal(ks[5], (MEM_SIZE, NUM_CLASSES), jnp.float32),
        "bc":     scale * jax.random.normal(ks[6], (1, NUM_CLASSES), jnp.float32),
    }


# --------------------------------- main --------------------------------------
if __name__ == "__main__":
    key = jax.random.PRNGKey(0)
    pkey, xkey = jax.random.split(key)
    params = make_params(pkey)
    prepared = jax.tree_util.tree_map(
        jax.block_until_ready, prepare_params(params)
    )  # one-time fold/pad, outside the per-call hot path

    # NCHW image input, as in the PyTorch module.
    x = jax.random.normal(xkey, (BATCH, CHANNELS, SPATIAL, SPATIAL), jnp.float32)

    out = jax.jit(selftaught_forward)(x, prepared)
    out = jax.block_until_ready(out)

    assert out.shape == (BATCH, NUM_CLASSES)
    # log_softmax rows must sum (in prob space) to ~1 over the real classes
    assert jnp.allclose(jnp.sum(jnp.exp(out), axis=-1), 1.0, atol=1e-3)
    print("KERNEL_OK")
</pallas_src>

<mosaic_0001>
module attributes {stable_mosaic.version = 11 : i64} {
  func.func @selftaught_kernel(%arg0: i32, %arg1: memref<2x1024xbf16, #tpu.memory_space<vmem>>, %arg2: memref<1024x32xbf16, #tpu.memory_space<vmem>>, %arg3: memref<32x64xf32, #tpu.memory_space<vmem>>, %arg4: memref<1x64xf32, #tpu.memory_space<vmem>>, %arg5: memref<64x128xf32, #tpu.memory_space<vmem>>, %arg6: memref<1x128xf32, #tpu.memory_space<vmem>>, %arg7: memref<2x128xf32, #tpu.memory_space<vmem>>) attributes {dimension_semantics = [#tpu.dimension_semantics<parallel>], iteration_bounds = array<i64: 1>, scalar_prefetch = 0 : i64, scratch_operands = 0 : i64, tpu.core_type = #tpu.core_type<tc>, window_params = [{transform_indices = @transform_0, window_bounds = array<i64: 2, 1024>}, {pipeline_mode = #tpu.pipeline_mode<synchronous>, transform_indices = @transform_1, window_bounds = array<i64: 1024, 32>}, {pipeline_mode = #tpu.pipeline_mode<synchronous>, transform_indices = @transform_2, window_bounds = array<i64: 32, 64>}, {pipeline_mode = #tpu.pipeline_mode<synchronous>, transform_indices = @transform_3, window_bounds = array<i64: 1, 64>}, {pipeline_mode = #tpu.pipeline_mode<synchronous>, transform_indices = @transform_4, window_bounds = array<i64: 64, 128>}, {pipeline_mode = #tpu.pipeline_mode<synchronous>, transform_indices = @transform_5, window_bounds = array<i64: 1, 128>}, {transform_indices = @transform_6, window_bounds = array<i64: 2, 128>}]} {
    %c0 = arith.constant 0 : index
    %c0_0 = arith.constant 0 : index
    %0 = vector.load %arg1[%c0, %c0_0] : memref<2x1024xbf16, #tpu.memory_space<vmem>>, vector<2x1024xbf16>
    %c0_1 = arith.constant 0 : index
    %c0_2 = arith.constant 0 : index
    %1 = vector.load %arg2[%c0_1, %c0_2] : memref<1024x32xbf16, #tpu.memory_space<vmem>>, vector<1024x32xbf16>
    %cst = arith.constant dense<0.000000e+00> : vector<2x32xf32>
    %2 = tpu.matmul %0, %1, %cst {dimension_numbers = #tpu.dot_dimension_numbers<[1], [0], [0], [1], [0, 0, 1, 1], [], []>} : vector<2x1024xbf16>, vector<1024x32xbf16>, vector<2x32xf32> -> vector<2x32xf32>
    %3 = math.tanh %2 : vector<2x32xf32>
    %c0_3 = arith.constant 0 : index
    %c0_4 = arith.constant 0 : index
    %4 = vector.load %arg3[%c0_3, %c0_4] : memref<32x64xf32, #tpu.memory_space<vmem>>, vector<32x64xf32>
    %cst_5 = arith.constant dense<0.000000e+00> : vector<2x64xf32>
    %5 = tpu.matmul %3, %4, %cst_5 {dimension_numbers = #tpu.dot_dimension_numbers<[1], [0], [0], [1], [0, 0, 1, 1], [], []>} : vector<2x32xf32>, vector<32x64xf32>, vector<2x64xf32> -> vector<2x64xf32>
    %c0_6 = arith.constant 0 : index
    %c0_7 = arith.constant 0 : index
    %6 = vector.load %arg4[%c0_6, %c0_7] : memref<1x64xf32, #tpu.memory_space<vmem>>, vector<1x64xf32>
    %7 = vector.broadcast %6 : vector<1x64xf32> to vector<2x64xf32>
    %8 = arith.addf %5, %7 : vector<2x64xf32>
    %cst_8 = arith.constant 0.000000e+00 : f32
    %cst_9 = arith.constant 6.000000e+00 : f32
    %9 = vector.broadcast %cst_8 : f32 to vector<2x64xf32>
    %10 = arith.maximumf %9, %8 : vector<2x64xf32>
    %11 = vector.broadcast %cst_9 : f32 to vector<2x64xf32>
    %12 = arith.minimumf %11, %10 : vector<2x64xf32>
    %c0_10 = arith.constant 0 : index
    %c0_11 = arith.constant 0 : index
    %13 = vector.load %arg5[%c0_10, %c0_11] : memref<64x128xf32, #tpu.memory_space<vmem>>, vector<64x128xf32>
    %cst_12 = arith.constant dense<0.000000e+00> : vector<2x128xf32>
    %14 = tpu.matmul %12, %13, %cst_12 {dimension_numbers = #tpu.dot_dimension_numbers<[1], [0], [0], [1], [0, 0, 1, 1], [], []>} : vector<2x64xf32>, vector<64x128xf32>, vector<2x128xf32> -> vector<2x128xf32>
    %c0_13 = arith.constant 0 : index
    %c0_14 = arith.constant 0 : index
    %15 = vector.load %arg6[%c0_13, %c0_14] : memref<1x128xf32, #tpu.memory_space<vmem>>, vector<1x128xf32>
    %16 = vector.broadcast %15 : vector<1x128xf32> to vector<2x128xf32>
    %17 = arith.addf %14, %16 : vector<2x128xf32>
    %cst_15 = arith.constant dense<0xFF800000> : vector<2xf32>
    %18 = vector.multi_reduction <maximumf>, %17, %cst_15 [1] : vector<2x128xf32> to vector<2xf32>
    %19 = vector.shape_cast %18 : vector<2xf32> to vector<2x1xf32>
    %20 = vector.broadcast %19 : vector<2x1xf32> to vector<2x128xf32>
    %21 = arith.subf %17, %20 : vector<2x128xf32>
    %22 = math.exp %21 : vector<2x128xf32>
    %cst_16 = arith.constant dense<0.000000e+00> : vector<2xf32>
    %23 = vector.multi_reduction <add>, %22, %cst_16 [1] : vector<2x128xf32> to vector<2xf32>
    %24 = vector.shape_cast %23 : vector<2xf32> to vector<2x1xf32>
    %25 = math.log %24 : vector<2x1xf32>
    %26 = vector.broadcast %25 : vector<2x1xf32> to vector<2x128xf32>
    %27 = arith.subf %21, %26 : vector<2x128xf32>
    %c0_17 = arith.constant 0 : index
    %c0_18 = arith.constant 0 : index
    %28 = vector.load %arg7[%c0_17, %c0_18] : memref<2x128xf32, #tpu.memory_space<vmem>>, vector<2x128xf32>
    tpu.vector_store %arg7[%c0_17, %c0_18], %27 {strides = array<i32>} : memref<2x128xf32, #tpu.memory_space<vmem>>, vector<2x128xf32>,
    return
  }
  func.func @transform_0(%arg0: i32) -> (i32, i32) {
    %c0_i32 = arith.constant 0 : i32
    %c0_i32_0 = arith.constant 0 : i32
    return %arg0, %c0_i32 : i32, i32
  }
  func.func @transform_1(%arg0: i32) -> (i32, i32) {
    %c0_i32 = arith.constant 0 : i32
    %c0_i32_0 = arith.constant 0 : i32
    %c0_i32_1 = arith.constant 0 : i32
    return %c0_i32, %c0_i32_0 : i32, i32
  }
  func.func @transform_2(%arg0: i32) -> (i32, i32) {
    %c0_i32 = arith.constant 0 : i32
    %c0_i32_0 = arith.constant 0 : i32
    %c0_i32_1 = arith.constant 0 : i32
    return %c0_i32, %c0_i32_0 : i32, i32
  }
  func.func @transform_3(%arg0: i32) -> (i32, i32) {
    %c0_i32 = arith.constant 0 : i32
    %c0_i32_0 = arith.constant 0 : i32
    %c0_i32_1 = arith.constant 0 : i32
    return %c0_i32, %c0_i32_0 : i32, i32
  }
  func.func @transform_4(%arg0: i32) -> (i32, i32) {
    %c0_i32 = arith.constant 0 : i32
    %c0_i32_0 = arith.constant 0 : i32
    %c0_i32_1 = arith.constant 0 : i32
    return %c0_i32, %c0_i32_0 : i32, i32
  }
  func.func @transform_5(%arg0: i32) -> (i32, i32) {
    %c0_i32 = arith.constant 0 : i32
    %c0_i32_0 = arith.constant 0 : i32
    %c0_i32_1 = arith.constant 0 : i32
    return %c0_i32, %c0_i32_0 : i32, i32
  }
  func.func @transform_6(%arg0: i32) -> (i32, i32) {
    %c0_i32 = arith.constant 0 : i32
    %c0_i32_0 = arith.constant 0 : i32
    return %arg0, %c0_i32 : i32, i32
  }
}

</mosaic_0001>

<bundles_post_ra>
// kernel: selftaught_forward.1
= control target key start
LH: loop header
LB: loop body
LE: loop exit
PB: predicated region body
PF: predicated region fallthrough
CT: control target
= control target key end

     0   :  { %v159_v28 = vlaneseq  ;;  %v1279_v36 = vmov 1966171168   ;;  %s1581_s0 = inlined_call_operand.vmem [shape: bf16[2,1024], index: 0, kind: input, shape index: {}]   ;;  %s1582_s1 = inlined_call_operand.vmem [shape: bf16[1024,32], index: 1, kind: input, shape index: {}]   ;;  %s1583_s2 = inlined_call_operand.vmem [shape: f32[32,64], index: 2, kind: input, shape index: {}]   ;;  %s1584_s3 = inlined_call_operand.vmem [shape: f32[1,64], index: 3, kind: input, shape index: {}]   ;;  %s1585_s4 = inlined_call_operand.vmem [shape: f32[64,128], index: 4, kind: input, shape index: {}]   ;;  %s1586_s5 = inlined_call_operand.vmem [shape: f32[1,128], index: 5, kind: input, shape index: {}]   ;;  %s1587_s6 = inlined_call_operand.hbm [shape: f32[2,128], index: 6, kind: output, shape index: {}]  }
   0x1   :  { %v1184_v0 = vld [vmem:[%s1582_s1 + $0x40] sm:$0xff]   ;;  %v1188_v4 = vld [vmem:[%s1582_s1 + $0x48] sm:$0xff]   ;;  %v1192_v8 = vld [vmem:[%s1582_s1 + $0x50] sm:$0xff]   ;;  %v157_v37 = vunpack.c.l.s4 %v1279_v36 }
   0x2   :  { %v1185_v1 = vld [vmem:[%s1582_s1 + $0xc0] sm:$0xff]   ;;  %1029 = vmatprep.subr.bf16.mxu0 %v1184_v0  ;;  %v1189_v5 = vld [vmem:[%s1582_s1 + $0xc8] sm:$0xff]   ;;  %v1193_v9 = vld [vmem:[%s1582_s1 + $0xd0] sm:$0xff]   ;;  %v160_v33 = vshrl.u32 %v159_v28, 7 }
   0x3   :  { %v1186_v2 = vld [vmem:[%s1582_s1] sm:$0xff]   ;;  %1051 = vmatprep.subr.bf16.mxu1 %v1185_v1  ;;  %v1190_v6 = vld [vmem:[%s1582_s1 + $0x8] sm:$0xff]   ;;  %v1194_v10 = vld [vmem:[%s1582_s1 + $0x10] sm:$0xff]   ;;  %v158_v40 = vunpack.c.0.s8 %v157_v37 }
   0x4   :  { %v1187_v3 = vld [vmem:[%s1582_s1 + $0x80] sm:$0xff]   ;;  %1030 = vmatpush3.bf16.msra.mxu0 %v1186_v2  ;;  %v1191_v7 = vld [vmem:[%s1582_s1 + $0x88] sm:$0xff]   ;;  %v1195_v11 = vld [vmem:[%s1582_s1 + $0x90] sm:$0xff]  }
   0x5   :  { %1052 = vmatpush3.bf16.msra.mxu1 %v1187_v3  ;;  %1031 = vmatprep.subr.bf16.mxu0 %v1188_v4  ;;  %v1196_v12 = vld [vmem:[%s1582_s1 + $0x58] sm:$0xff]   ;;  %v1200_v16 = vld [vmem:[%s1582_s1 + $0x60] sm:$0xff]   ;;  %v1204_v20 = vld [vmem:[%s1582_s1 + $0x68] sm:$0xff]   ;;  %v1424_v41 = vsub.s32 %v158_v40, %v160_v33 }
   0x6   :  { %1053 = vmatprep.subr.bf16.mxu1 %v1189_v5  ;;  %v1197_v13 = vld [vmem:[%s1582_s1 + $0xd8] sm:$0xff]   ;;  %v1201_v17 = vld [vmem:[%s1582_s1 + $0xe0] sm:$0xff]   ;;  %v1205_v21 = vld [vmem:[%s1582_s1 + $0xe8] sm:$0xff]  }
   0x7   :  { %v1198_v14 = vld [vmem:[%s1582_s1 + $0x18] sm:$0xff]   ;;  %v1202_v18 = vld [vmem:[%s1582_s1 + $0x20] sm:$0xff]   ;;  %v1206_v22 = vld [vmem:[%s1582_s1 + $0x28] sm:$0xff]  }
   0x8   :  { %1032 = vmatpush3.bf16.msra.mxu0 %v1190_v6  ;;  %v1199_v15 = vld [vmem:[%s1582_s1 + $0x98] sm:$0xff]   ;;  %v1203_v19 = vld [vmem:[%s1582_s1 + $0xa0] sm:$0xff]   ;;  %v1207_v23 = vld [vmem:[%s1582_s1 + $0xa8] sm:$0xff]  }
   0x9   :  { %1054 = vmatpush3.bf16.msra.mxu1 %v1191_v7  ;;  %1033 = vmatprep.subr.bf16.mxu0 %v1192_v8  ;;  %v1208_v24 = vld [vmem:[%s1582_s1 + $0x70] sm:$0xff]   ;;  %v1212_v29 = vld [vmem:[%s1582_s1 + $0x78] sm:$0xff]   ;;  %v25_v34 = vld [vmem:[%s1581_s0] sm:$0xff] }
   0xa   :  { %1055 = vmatprep.subr.bf16.mxu1 %v1193_v9  ;;  %v1209_v25 = vld [vmem:[%s1582_s1 + $0xf0] sm:$0xff]   ;;  %v1213_v30 = vld [vmem:[%s1582_s1 + $0xf8] sm:$0xff]   ;;  %v1217_v35 = vld [vmem:[%s1582_s1 + $0x140] sm:$0xff]   ;;  %v155_v39 = vcombine.high %v25_v34, %v25_v34  ;;  %v162_v42 = vrot.slane %v25_v34, %v1424_v41 }
   0xb   :  { %v1210_v26 = vld [vmem:[%s1582_s1 + $0x30] sm:$0xff]   ;;  %v1214_v31 = vld [vmem:[%s1582_s1 + $0x38] sm:$0xff]   ;;  %v1218_v38 = vld [vmem:[%s1582_s1 + $0x1c0] sm:$0xff]  }
   0xc   :  { %1034 = vmatpush3.bf16.msra.mxu0 %v1194_v10  ;;  %v1211_v27 = vld [vmem:[%s1582_s1 + $0xb0] sm:$0xff]   ;;  %v1215_v32 = vld [vmem:[%s1582_s1 + $0xb8] sm:$0xff]   ;;  %v1428_v43 = vrot.slane %v155_v39, %v1424_v41  ;;  %v170_v44 = vcombine.high %v162_v42, %v162_v42  ;;  %v178_v45 = vrot.slane %v162_v42, %v1424_v41  ;;  %v1219_v48 = vld [vmem:[%s1582_s1 + $0x100] sm:$0xff]  }
   0xd   :  { %1056 = vmatpush3.bf16.msra.mxu1 %v1195_v11  ;;  %1035 = vmatprep.subr.bf16.mxu0 %v1196_v12  ;;  %v1221_v51 = vld [vmem:[%s1582_s1 + $0x148] sm:$0xff]   ;;  %v1220_v53 = vld [vmem:[%s1582_s1 + $0x180] sm:$0xff]   ;;  %v1225_v57 = vld [vmem:[%s1582_s1 + $0x150] sm:$0xff]  }
   0xe   :  { %1057 = vmatprep.subr.bf16.mxu1 %v1197_v13  ;;  %v171_v46 = vcombine.high %v1428_v43, %v1428_v43  ;;  %v192_v47 = vrot.slane %v170_v44, %v1424_v41  ;;  %v200_v50 = vcombine.high %v178_v45, %v178_v45  ;;  %v1222_v54 = vld [vmem:[%s1582_s1 + $0x1c8] sm:$0xff]   ;;  %v1226_v59 = vld [vmem:[%s1582_s1 + $0x1d0] sm:$0xff]   ;;  %v1229_v61 = vld [vmem:[%s1582_s1 + $0x158] sm:$0xff]  }
   0xf   :  { %v1223_v56 = vld [vmem:[%s1582_s1 + $0x108] sm:$0xff]   ;;  %v1227_v60 = vld [vmem:[%s1582_s1 + $0x110] sm:$0xff]   ;;  %v1230_v63 = vld [vmem:[%s1582_s1 + $0x1d8] sm:$0xff]  }
  0x10   :  { %1036 = vmatpush3.bf16.msra.mxu0 %v1198_v14  ;;  %v199_v49 = vrot.slane %v171_v46, %v1424_v41  ;;  %628 = vmatprep.mubr.bf16.mxu0 %v192_v47  ;;  %v202_v52 = vcombine.high %v192_v47, %v192_v47  ;;  %v1224_v58 = vld [vmem:[%s1582_s1 + $0x188] sm:$0xff]   ;;  %v1228_v62 = vld [vmem:[%s1582_s1 + $0x190] sm:$0xff]   ;;  %v1231_v0 = vld [vmem:[%s1582_s1 + $0x118] sm:$0xff]  }
  0x11   :  { %1058 = vmatpush3.bf16.msra.mxu1 %v1199_v15  ;;  %1037 = vmatprep.subr.bf16.mxu0 %v1200_v16  ;;  %v1233_v1 = vld [vmem:[%s1582_s1 + $0x160] sm:$0xff]   ;;  %v1232_v2 = vld [vmem:[%s1582_s1 + $0x198] sm:$0xff]   ;;  %v1237_v5 = vld [vmem:[%s1582_s1 + $0x168] sm:$0xff]  }
  0x12   :  { %1059 = vmatprep.subr.bf16.mxu1 %v1201_v17  ;;  %v203_v55 = vcombine.high %v199_v49, %v199_v49  ;;  %668 = vmatprep.mubr.bf16.mxu1 %v202_v52  ;;  %v1234_v3 = vld [vmem:[%s1582_s1 + $0x1e0] sm:$0xff]   ;;  %v1238_v7 = vld [vmem:[%s1582_s1 + $0x1e8] sm:$0xff]   ;;  %v1241_v9 = vld [vmem:[%s1582_s1 + $0x170] sm:$0xff]  }
  0x13   :  { %v1235_v4 = vld [vmem:[%s1582_s1 + $0x120] sm:$0xff]   ;;  %v1239_v8 = vld [vmem:[%s1582_s1 + $0x128] sm:$0xff]  }
  0x14   :  { %1038 = vmatpush3.bf16.msra.mxu0 %v1202_v18  ;;  %v1236_v6 = vld [vmem:[%s1582_s1 + $0x1a0] sm:$0xff]  }
  0x15   :  { %1060 = vmatpush3.bf16.msra.mxu1 %v1203_v19  ;;  %1039 = vmatprep.subr.bf16.mxu0 %v1204_v20 }
  0x16   :  { %1061 = vmatprep.subr.bf16.mxu1 %v1205_v21 }
  0x18   :  { %1040 = vmatpush3.bf16.msra.mxu0 %v1206_v22 }
  0x19   :  { %1062 = vmatpush3.bf16.msra.mxu1 %v1207_v23  ;;  %1041 = vmatprep.subr.bf16.mxu0 %v1208_v24 }
  0x1a   :  { %1063 = vmatprep.subr.bf16.mxu1 %v1209_v25 }
  0x1c   :  { %1042 = vmatpush3.bf16.msra.mxu0 %v1210_v26 }
  0x1d   :  { %1064 = vmatpush3.bf16.msra.mxu1 %v1211_v27  ;;  %1043 = vmatprep.subr.bf16.mxu0 %v1212_v29 }
  0x1e   :  { %1065 = vmatprep.subr.bf16.mxu1 %v1213_v30 }
  0x20   :  { %1044 = vmatpush3.bf16.msra.mxu0 %v1214_v31 }
  0x21   :  { %1066 = vmatpush3.bf16.msra.mxu1 %v1215_v32  ;;  %1073 = vmatprep.subr.bf16.mxu0 %v1217_v35 }
  0x22   :  { %1095 = vmatprep.subr.bf16.mxu1 %v1218_v38 }
  0x23   :  { %629 = vmatmul.mubr.bf16.vlgmr.msra.gmra.mrb[0].mxu0 %v178_v45 }
  0x24   :  { %1074 = vmatpush3.bf16.msra.mxu0 %v1219_v48  ;;  %669 = vmatmul.mubr.bf16.vlgmr.msra.gmra.mrb[0].mxu1 %v200_v50 }
  0x25   :  { %1075 = vmatprep.subr.bf16.mxu0 %v1221_v51  ;;  %1096 = vmatpush3.bf16.msra.mxu1 %v1220_v53 }
  0x26   :  { %708 = vmatprep.mubr.bf16.mxu0 %v199_v49  ;;  %1097 = vmatprep.subr.bf16.mxu1 %v1222_v54 }
  0x27   :  { %748 = vmatprep.mubr.bf16.mxu1 %v203_v55 }
  0x28   :  { %1076 = vmatpush3.bf16.msra.mxu0 %v1223_v56 }
  0x29   :  { %1077 = vmatprep.subr.bf16.mxu0 %v1225_v57  ;;  %1098 = vmatpush3.bf16.msra.mxu1 %v1224_v58 }
  0x2a   :  { %1099 = vmatprep.subr.bf16.mxu1 %v1226_v59 }
  0x2c   :  { %1078 = vmatpush3.bf16.msra.mxu0 %v1227_v60 }
  0x2d   :  { %1079 = vmatprep.subr.bf16.mxu0 %v1229_v61  ;;  %1100 = vmatpush3.bf16.msra.mxu1 %v1228_v62 }
  0x2e   :  { %1101 = vmatprep.subr.bf16.mxu1 %v1230_v63 }
  0x30   :  { %1080 = vmatpush3.bf16.msra.mxu0 %v1231_v0 }
  0x31   :  { %1081 = vmatprep.subr.bf16.mxu0 %v1233_v1  ;;  %1102 = vmatpush3.bf16.msra.mxu1 %v1232_v2 }
  0x32   :  { %1103 = vmatprep.subr.bf16.mxu1 %v1234_v3 }
  0x34   :  { %1082 = vmatpush3.bf16.msra.mxu0 %v1235_v4 }
  0x35   :  { %1083 = vmatprep.subr.bf16.mxu0 %v1237_v5 }
  0x36   :  { %11 = vsyncpa [#allocation3], 0  ;;  %1104 = vmatpush3.bf16.msra.mxu1 %v1236_v6  ;;  %v1240_v10 = vld [vmem:[%s1582_s1 + $0x1a8] sm:$0xff]   ;;  %v1242_v11 = vld [vmem:[%s1582_s1 + $0x1f0] sm:$0xff]   ;;  %v185_v17 = vrot.slane %v1428_v43, %v1424_v41  ;;  %v1280_v23 = vmov 0.0|0.0   ;;  %vm1281_vm0 = vmmov 0  }
  0x37   :  { %1105 = vmatprep.subr.bf16.mxu1 %v1238_v7  ;;  %v1243_v12 = vld [vmem:[%s1582_s1 + $0x130] sm:$0xff]   ;;  %v1245_v13 = vld [vmem:[%s1582_s1 + $0x178] sm:$0xff]   ;;  %v757_v20 = vld [vmem:[%s1583_s2] sm:$0xff]  ;;  %v1282_v26 = vmov 0.0   ;;  %vm768_vm1 = vcmask 261120   ;;  %vm859_vm2 = vcmask 523264  }
  0x38   :  { %1084 = vmatpush3.bf16.msra.mxu0 %v1239_v8  ;;  %v1244_v14 = vld [vmem:[%s1582_s1 + $0x1b0] sm:$0xff]   ;;  %v1246_v15 = vld [vmem:[%s1582_s1 + $0x1f8] sm:$0xff]   ;;  %v201_v19 = vcombine.high %v185_v17, %v185_v17  ;;  %v758_v21 = vld [vmem:[%s1583_s2 + $0x8] sm:$0xff]  ;;  %vm933_vm3 = vcmask 1041408  }
  0x39   :  { %1085 = vmatprep.subr.bf16.mxu0 %v1241_v9  ;;  %v1247_v16 = vld [vmem:[%s1582_s1 + $0x138] sm:$0xff]   ;;  %v759_v22 = vld [vmem:[%s1583_s2 + $0x10] sm:$0xff]  ;;  %v1162_v24 = vpack.c.bf16 %v758_v21, %v757_v20  ;;  %v844_v28 = vld [vmem:[%s1585_s4] sm:$0xff] }
  0x3a   :  { %1106 = vmatpush3.bf16.msra.mxu1 %v1240_v10  ;;  %v1248_v18 = vld [vmem:[%s1582_s1 + $0x1b8] sm:$0xff]   ;;  %v845_v29 = vld [vmem:[%s1585_s4 + $0x8] sm:$0xff]  ;;  %v846_v30 = vld [vmem:[%s1585_s4 + $0x10] sm:$0xff] }
  0x3b   :  { %1107 = vmatprep.subr.bf16.mxu1 %v1242_v11  ;;  %v760_v25 = vld [vmem:[%s1583_s2 + $0x18] sm:$0xff]  ;;  %v1168_v31 = vpack.c.bf16 %v845_v29, %v844_v28  ;;  %v848_v58 = vld [vmem:[%s1585_s4 + $0x20] sm:$0xff]  ;;  %v849_v59 = vld [vmem:[%s1585_s4 + $0x28] sm:$0xff] }
  0x3c   :  { %1086 = vmatpush3.bf16.msra.mxu0 %v1243_v12  ;;  %v1165_v27 = vpack.c.bf16 %v760_v25, %v759_v22  ;;  %v847_v32 = vld [vmem:[%s1585_s4 + $0x18] sm:$0xff]  ;;  %v1174_v60 = vpack.c.bf16 %v849_v59, %v848_v58  ;;  %v850_v61 = vld [vmem:[%s1585_s4 + $0x30] sm:$0xff]  ;;  %v1025_v0 = vld [vmem:[%s1584_s3] ss:$0 sm:$0xff]  ;;  %s1283_s3 = smov [#allocation2]  }
  0x3d   :  { %1087 = vmatprep.subr.bf16.mxu0 %v1245_v13  ;;  %v1171_v33 = vpack.c.bf16 %v847_v32, %v846_v30  ;;  %v851_v62 = vld [vmem:[%s1585_s4 + $0x38] sm:$0xff]  ;;  %v1027_v6 = vld [vmem:[%s1586_s5] ss:$0 sm:$0xff]  ;;  %s953_s4 = sshll.u32 %s1283_s3, 4  ;;  %s954_s4 = int_to_ptr.vmem [resolvable:$true] %s953_s4 }
  0x3e   :  { %1108 = vmatpush3.bf16.msra.mxu1 %v1244_v14  ;;  %v1177_v63 = vpack.c.bf16 %v851_v62, %v850_v61  ;;  %s1255_s5 = scalar_lea.vmem %s954_s4, 32  ;;  %p1260_p1 = scmp.lt.s32.totalorder %s954_s4, %s954_s4 }
  0x3f   :  { %1109 = vmatprep.subr.bf16.mxu1 %v1246_v15  ;;  %p1256_p0 = scmp.ne.s32.totalorder %s954_s4, %s1255_s5  ;;  %p1261_p2 = scmp.lt.s32.totalorder %s1255_s5, %s1255_s5 }
  0x40   :  { %1088 = vmatpush3.bf16.msra.mxu0 %v1247_v16 }
  0x41   :  { %1161 = vmatprep.subr.bf16.mxu0 %v1280_v23  ;;  %p1262_p3 = por %p1261_p2, %p1260_p1 }
  0x42   :  { %1110 = vmatpush3.bf16.msra.mxu1 %v1248_v18 }
  0x43   :  { %709 = vmatmul.mubr.bf16.vlgmr.msra.gmra.mrb[4].mxu0 %v185_v17  ;;  %1167 = vmatprep.subr.bf16.mxu1 %v1280_v23  ;;  %p1263_p4 = pnand %p1262_p3, %p1256_p0 }
  0x44   :  { %1139 = vmatprep.mubr.msk.f32.mxu0 %vm1281_vm0, %v1282_v26  ;;  %1163 = vmatpush3.bf16.msra.mxu0 %v1162_v24 }
  0x45   :  { %749 = vmatmul.mubr.bf16.vlgmr.msra.gmra.mrb[4].mxu1 %v201_v19  ;;  %1164 = vmatprep.subr.bf16.mxu0 %v1280_v23 }
  0x46   :  { %1158 = vmatprep.mubr.msk.f32.mxu1 %vm1281_vm0, %v1282_v26  ;;  %1169 = vmatpush3.bf16.msra.mxu1 %v1168_v31 }
  0x47   :  { %1170 = vmatprep.subr.bf16.mxu1 %v1280_v23 }
  0x48   :  { %1166 = vmatpush3.bf16.msra.mxu0 %v1165_v27 }
  0x4a   :  { %1172 = vmatpush3.bf16.msra.mxu1 %v1171_v33 }
  0x4b   :  { %1173 = vmatprep.subr.bf16.mxu1 %v1280_v23 }
  0x4e   :  { %1175 = vmatpush3.bf16.msra.mxu1 %v1174_v60 }
  0x4f   :  { %1176 = vmatprep.subr.bf16.mxu1 %v1280_v23 }
  0x52   :  { %1178 = vmatpush3.bf16.msra.mxu1 %v1177_v63 }
  0xf6   :  { %v1045_v34 = vpop.f32.mrb[0].mxu0 }
  0xf7   :  { %v1046_v35 = vpop.f32.mrb[1].mxu0  ;;  %v1067_v36 = vpop.f32.mrb[0].mxu1 }
  0xf8   :  { %v1047_v37 = vadd.f32 %v1046_v35, %v1045_v34  ;;  %v1048_v38 = vpop.f32.mrb[2].mxu0  ;;  %v1068_v39 = vpop.f32.mrb[1].mxu1 }
  0xf9   :  { %v1049_v40 = vpop.f32.mrb[3].mxu0  ;;  %v1069_v41 = vadd.f32 %v1068_v39, %v1067_v36  ;;  %v1070_v42 = vpop.f32.mrb[2].mxu1 }
  0xfa   :  { %v1071_v43 = vpop.f32.mrb[3].mxu1 }
  0xfb   :  { %v671_v44 = vadd.f32 %v1069_v41, %v1047_v37 }
 0x116   :  { %v1089_v45 = vpop.f32.mrb[4].mxu0 }
 0x117   :  { %v1090_v46 = vpop.f32.mrb[5].mxu0 }
 0x118   :  { %v1111_v47 = vpop.f32.mrb[4].mxu1  ;;  %v1091_v48 = vadd.f32 %v1090_v46, %v1089_v45  ;;  %v1092_v49 = vpop.f32.mrb[6].mxu0 }
 0x119   :  { %v1112_v50 = vpop.f32.mrb[5].mxu1  ;;  %v1093_v51 = vpop.f32.mrb[7].mxu0 }
 0x11a   :  { %v711_v52 = vadd.f32 %v1091_v48, %v671_v44  ;;  %v1113_v53 = vadd.f32 %v1112_v50, %v1111_v47  ;;  %v1114_v54 = vpop.f32.mrb[6].mxu1 }
 0x11b   :  { %v1115_v55 = vpop.f32.mrb[7].mxu1 }
 0x11c   :  { %v751_v56 = vadd.f32 %v1113_v53, %v711_v52 }
 0x11e   :  { %1249 = vtanh.f32 %v751_v56 }
 0x128   :  { %v1250_v57 = vpop.eup %1249 }
 0x129   :  { %1140 = vmatmul.mubr.msk.f32.vlgmr.msra.gmra.mrb[8].mxu0 %vm768_vm1, %v1250_v57 }
 0x1fc   :  { %v838_v1 = vpop.f32.mrb[8].mxu0 }
 0x1fd   :  { %v839_v2 = vadd.f32 %v1025_v0, %v838_v1  ;;  %v1141_v3 = vpop.f32.mrb[9].mxu0 }
 0x1ff   :  { %v842_v4 = vmax.f32 %v839_v2, 0.0 }
 0x201   :  { %v843_v5 = vmin.f32 %v842_v4, 6.0 }
 0x203   :  { %1159 = vmatmul.mubr.msk.f32.vlgmr.msra.gmra.mrb[8].mxu1 %vm859_vm2, %v843_v5 }
 0x2d6   :  { %v929_v7 = vpop.f32.mrb[8].mxu1 }
 0x2d7   :  { %v930_v8 = vadd.f32 %v1027_v6, %v929_v7  ;;  %v1160_v9 = vpop.f32.mrb[9].mxu1 }
 0x2d9   :  { %v934_v10 = vsel %vm933_vm3, %v930_v8, -inf }
 0x2da   :  { %935 = vmax.xlane.f32.xlu0 %v934_v10 }
 0x367   :  { %v936_v11 = vpop.xlane.xlu0 %935 }
 0x368   :  { %v937_v12 = vsub.f32 %v930_v8, %v936_v11 }
 0x36a   :  { %v938_v13 = vmul.f32 1.442695, %v937_v12 }
 0x36c   :  { %1251 = vpow2.f32 %v938_v13 }
 0x376   :  { %v1252_v14 = vpop.eup %1251 }
 0x377   :  { %v940_v15 = vsel %vm933_vm3, %v1252_v14, 0.0 }
 0x378   :  { %941 = vadd.xlane.f32.xlu0 %v940_v15 }
 0x405   :  { %v942_v16 = vpop.xlane.xlu0 %941 }
 0x406   :  { %1253 = vlog2.f32 %v942_v16 }
 0x410   :  { %v1254_v17 = vpop.eup %1253 }
 0x411   :  { %v944_v18 = vmul.f32 0.6931472, %v1254_v17 }
 0x413   :  { %v945_v19 = vsub.f32 %v937_v12, %v944_v18 }
 0x415   :  { %946 = vst [vmem:[#allocation2] sm:$0x3] %v945_v19 }
 0x416   :  { %1266 = shalt.err (!%p1263_p4)
}
 0x417   :  { %s1267_s7 = scalar_lea.hbm %s1587_s6, 32 }
 0x418   :  { %p1268_p5 = scmp.ne.s32.totalorder %s1587_s6, %s1267_s7  ;;  %p1271_p6 = scmp.lt.u32.totalorder %s1267_s7, %s1587_s6 }
 0x41a   :  { %p1273_p7 = pnand %p1271_p6, %p1268_p5 }
 0x41c   :  { %1276 = shalt.err (!%p1273_p7)
}
 0x41d   :  { %956 = dma.vmem_to_hbm [thread:$0]  %s954_s4, 32, %s1587_s6, [#allocation3]  }
 0x41e   :  { %1277 = dma.done.wait [#allocation3], 32  }
 0x41f   :  { %1278 = vsyncadd [#allocation3], 4294967264 }
 0x420   :  { %960 = vsyncpa [#allocation3], 1 }

</bundles_post_ra>
